<compile_context>
chip_gen: v6e
topology: v6e:2x2x1
jax: 0.10.0
libtpu: 0.0.40
codegen_flags: <defaults>
</compile_context>

<pallas_src>
import jax
import jax.numpy as jnp
from jax.experimental import pallas as pl
from jax.experimental.pallas import tpu as pltpu


def _ptmodule_kernel(x1_ref, x2_ref, x3_ref, x4_ref, x5_ref,
                     add_ref, sub_ref, mul_ref, div_ref, pow_ref):
    x1 = x1_ref[...]
    x2 = x2_ref[...]
    x3 = x3_ref[...]
    x4 = x4_ref[...]
    x5 = x5_ref[...]

    add_ref[...] = x1 + x2              # torch.add(x1, x2)
    sub_ref[...] = x3 - x4              # torch.sub(x3, x4)
    mul_ref[...] = x1 * x5              # torch.mul(x1, x5)
    # Keep exact divide (no approx reciprocal) so results match torch.div bit-for-bit
    # within f32 rounding; kernel is memory-bound so this costs nothing extra.
    div_ref[...] = x4 / (x5 + 1e-05)    # torch.div(x4, x5 + 1e-5)
    pow_ref[...] = x2 * x2              # torch.pow(x2, 2)


def ptmodule_forward(x1, x2, x3, x4, x5, *,
                     per_buffer_bytes=2 << 20,       # ~2 MiB tile per array
                     vmem_limit_bytes=48 << 20):     # 20 buffers * 2 MiB = 40 MiB + headroom
    assert x1.shape == x2.shape == x3.shape == x4.shape == x5.shape
    assert x1.dtype == x2.dtype == x3.dtype == x4.dtype == x5.dtype
    M, N = x1.shape
    itemsize = jnp.dtype(x1.dtype).itemsize

    # --- pick tm: largest multiple-of-8 row count whose (tm, N) tile fits the
    #     per-buffer budget; if the whole array fits, use a single block. ---
    row_bytes = N * itemsize
    rows = max(1, per_buffer_bytes // row_bytes)
    if rows >= M:
        tm = M                              # single grid point (fast path for small inputs)
    else:
        tm = max(8, (rows // 8) * 8)        # sublane-aligned; edge blocks handled by Pallas

    grid = (pl.cdiv(M, tm),)

    # Full-width, lane-dense blocks; tile only along M.
    spec = pl.BlockSpec((tm, N), lambda i: (i, 0))
    out_shape = jax.ShapeDtypeStruct((M, N), x1.dtype)

    return pl.pallas_call(
        _ptmodule_kernel,
        grid=grid,
        in_specs=[spec] * 5,
        out_specs=[spec] * 5,
        out_shape=[out_shape] * 5,
        compiler_params=pltpu.CompilerParams(
            dimension_semantics=("parallel",),       # lets v7x shard the grid across its 2 TCs
            vmem_limit_bytes=vmem_limit_bytes,
        ),
    )(x1, x2, x3, x4, x5)


if __name__ == "__main__":
    key = jax.random.PRNGKey(0)
    k1, k2, k3, k4, k5 = jax.random.split(key, 5)
    shape = (128, 256)
    x1 = jax.random.normal(k1, shape, dtype=jnp.float32)
    x2 = jax.random.normal(k2, shape, dtype=jnp.float32)
    x3 = jax.random.normal(k3, shape, dtype=jnp.float32)
    x4 = jax.random.normal(k4, shape, dtype=jnp.float32)
    # keep x5 positive so the (x5 + 1e-5) denominator is well-conditioned
    x5 = jax.random.uniform(k5, shape, dtype=jnp.float32, minval=0.1, maxval=1.0)

    add, sub, mul, div, power = jax.block_until_ready(
        ptmodule_forward(x1, x2, x3, x4, x5))

    # reference check in plain JAX
    assert jnp.allclose(add, x1 + x2, atol=1e-6)
    assert jnp.allclose(sub, x3 - x4, atol=1e-6)
    assert jnp.allclose(mul, x1 * x5, atol=1e-6)
    assert jnp.allclose(div, x4 / (x5 + 1e-05), atol=1e-5)
    assert jnp.allclose(power, x2 ** 2, atol=1e-6)

    print("KERNEL_OK")
</pallas_src>

<mosaic_0001>
module attributes {stable_mosaic.version = 11 : i64} {
  func.func @_ptmodule_kernel(%arg0: i32, %arg1: memref<128x256xf32, #tpu.memory_space<vmem>>, %arg2: memref<128x256xf32, #tpu.memory_space<vmem>>, %arg3: memref<128x256xf32, #tpu.memory_space<vmem>>, %arg4: memref<128x256xf32, #tpu.memory_space<vmem>>, %arg5: memref<128x256xf32, #tpu.memory_space<vmem>>, %arg6: memref<128x256xf32, #tpu.memory_space<vmem>>, %arg7: memref<128x256xf32, #tpu.memory_space<vmem>>, %arg8: memref<128x256xf32, #tpu.memory_space<vmem>>, %arg9: memref<128x256xf32, #tpu.memory_space<vmem>>, %arg10: memref<128x256xf32, #tpu.memory_space<vmem>>) attributes {dimension_semantics = [#tpu.dimension_semantics<parallel>], iteration_bounds = array<i64: 1>, scalar_prefetch = 0 : i64, scratch_operands = 0 : i64, tpu.core_type = #tpu.core_type<tc>, window_params = [{transform_indices = @transform_0, window_bounds = array<i64: 128, 256>}, {transform_indices = @transform_1, window_bounds = array<i64: 128, 256>}, {transform_indices = @transform_2, window_bounds = array<i64: 128, 256>}, {transform_indices = @transform_3, window_bounds = array<i64: 128, 256>}, {transform_indices = @transform_4, window_bounds = array<i64: 128, 256>}, {transform_indices = @transform_5, window_bounds = array<i64: 128, 256>}, {transform_indices = @transform_6, window_bounds = array<i64: 128, 256>}, {transform_indices = @transform_7, window_bounds = array<i64: 128, 256>}, {transform_indices = @transform_8, window_bounds = array<i64: 128, 256>}, {transform_indices = @transform_9, window_bounds = array<i64: 128, 256>}]} {
    %c0 = arith.constant 0 : index
    %c0_0 = arith.constant 0 : index
    %0 = vector.load %arg1[%c0, %c0_0] : memref<128x256xf32, #tpu.memory_space<vmem>>, vector<128x256xf32>
    %c0_1 = arith.constant 0 : index
    %c0_2 = arith.constant 0 : index
    %1 = vector.load %arg2[%c0_1, %c0_2] : memref<128x256xf32, #tpu.memory_space<vmem>>, vector<128x256xf32>
    %c0_3 = arith.constant 0 : index
    %c0_4 = arith.constant 0 : index
    %2 = vector.load %arg3[%c0_3, %c0_4] : memref<128x256xf32, #tpu.memory_space<vmem>>, vector<128x256xf32>
    %c0_5 = arith.constant 0 : index
    %c0_6 = arith.constant 0 : index
    %3 = vector.load %arg4[%c0_5, %c0_6] : memref<128x256xf32, #tpu.memory_space<vmem>>, vector<128x256xf32>
    %c0_7 = arith.constant 0 : index
    %c0_8 = arith.constant 0 : index
    %4 = vector.load %arg5[%c0_7, %c0_8] : memref<128x256xf32, #tpu.memory_space<vmem>>, vector<128x256xf32>
    %5 = arith.addf %0, %1 : vector<128x256xf32>
    %c0_9 = arith.constant 0 : index
    %c0_10 = arith.constant 0 : index
    %6 = vector.load %arg6[%c0_9, %c0_10] : memref<128x256xf32, #tpu.memory_space<vmem>>, vector<128x256xf32>
    tpu.vector_store %arg6[%c0_9, %c0_10], %5 {strides = array<i32>} : memref<128x256xf32, #tpu.memory_space<vmem>>, vector<128x256xf32>,
    %7 = arith.subf %2, %3 : vector<128x256xf32>
    %c0_11 = arith.constant 0 : index
    %c0_12 = arith.constant 0 : index
    %8 = vector.load %arg7[%c0_11, %c0_12] : memref<128x256xf32, #tpu.memory_space<vmem>>, vector<128x256xf32>
    tpu.vector_store %arg7[%c0_11, %c0_12], %7 {strides = array<i32>} : memref<128x256xf32, #tpu.memory_space<vmem>>, vector<128x256xf32>,
    %9 = arith.mulf %0, %4 : vector<128x256xf32>
    %c0_13 = arith.constant 0 : index
    %c0_14 = arith.constant 0 : index
    %10 = vector.load %arg8[%c0_13, %c0_14] : memref<128x256xf32, #tpu.memory_space<vmem>>, vector<128x256xf32>
    tpu.vector_store %arg8[%c0_13, %c0_14], %9 {strides = array<i32>} : memref<128x256xf32, #tpu.memory_space<vmem>>, vector<128x256xf32>,
    %cst = arith.constant 9.99999974E-6 : f32
    %11 = vector.broadcast %cst : f32 to vector<128x256xf32>
    %12 = arith.addf %4, %11 : vector<128x256xf32>
    %13 = arith.divf %3, %12 : vector<128x256xf32>
    %c0_15 = arith.constant 0 : index
    %c0_16 = arith.constant 0 : index
    %14 = vector.load %arg9[%c0_15, %c0_16] : memref<128x256xf32, #tpu.memory_space<vmem>>, vector<128x256xf32>
    tpu.vector_store %arg9[%c0_15, %c0_16], %13 {strides = array<i32>} : memref<128x256xf32, #tpu.memory_space<vmem>>, vector<128x256xf32>,
    %15 = arith.mulf %1, %1 : vector<128x256xf32>
    %c0_17 = arith.constant 0 : index
    %c0_18 = arith.constant 0 : index
    %16 = vector.load %arg10[%c0_17, %c0_18] : memref<128x256xf32, #tpu.memory_space<vmem>>, vector<128x256xf32>
    tpu.vector_store %arg10[%c0_17, %c0_18], %15 {strides = array<i32>} : memref<128x256xf32, #tpu.memory_space<vmem>>, vector<128x256xf32>,
    return
  }
  func.func @transform_0(%arg0: i32) -> (i32, i32) {
    %c0_i32 = arith.constant 0 : i32
    %c0_i32_0 = arith.constant 0 : i32
    return %arg0, %c0_i32 : i32, i32
  }
  func.func @transform_1(%arg0: i32) -> (i32, i32) {
    %c0_i32 = arith.constant 0 : i32
    %c0_i32_0 = arith.constant 0 : i32
    return %arg0, %c0_i32 : i32, i32
  }
  func.func @transform_2(%arg0: i32) -> (i32, i32) {
    %c0_i32 = arith.constant 0 : i32
    %c0_i32_0 = arith.constant 0 : i32
    return %arg0, %c0_i32 : i32, i32
  }
  func.func @transform_3(%arg0: i32) -> (i32, i32) {
    %c0_i32 = arith.constant 0 : i32
    %c0_i32_0 = arith.constant 0 : i32
    return %arg0, %c0_i32 : i32, i32
  }
  func.func @transform_4(%arg0: i32) -> (i32, i32) {
    %c0_i32 = arith.constant 0 : i32
    %c0_i32_0 = arith.constant 0 : i32
    return %arg0, %c0_i32 : i32, i32
  }
  func.func @transform_5(%arg0: i32) -> (i32, i32) {
    %c0_i32 = arith.constant 0 : i32
    %c0_i32_0 = arith.constant 0 : i32
    return %arg0, %c0_i32 : i32, i32
  }
  func.func @transform_6(%arg0: i32) -> (i32, i32) {
    %c0_i32 = arith.constant 0 : i32
    %c0_i32_0 = arith.constant 0 : i32
    return %arg0, %c0_i32 : i32, i32
  }
  func.func @transform_7(%arg0: i32) -> (i32, i32) {
    %c0_i32 = arith.constant 0 : i32
    %c0_i32_0 = arith.constant 0 : i32
    return %arg0, %c0_i32 : i32, i32
  }
  func.func @transform_8(%arg0: i32) -> (i32, i32) {
    %c0_i32 = arith.constant 0 : i32
    %c0_i32_0 = arith.constant 0 : i32
    return %arg0, %c0_i32 : i32, i32
  }
  func.func @transform_9(%arg0: i32) -> (i32, i32) {
    %c0_i32 = arith.constant 0 : i32
    %c0_i32_0 = arith.constant 0 : i32
    return %arg0, %c0_i32 : i32, i32
  }
}

</mosaic_0001>

<bundles_post_ra>
// kernel: tpu_custom_call.1
= control target key start
LH: loop header
LB: loop body
LE: loop exit
PB: predicated region body
PF: predicated region fallthrough
CT: control target
= control target key end

     0   :  { %15 = vsyncpa [#allocation3], 0  ;;  %s1749_s0 = inlined_call_operand.hbm [shape: f32[128,256], index: 0, kind: input, shape index: {}]   ;;  %s1750_s1 = inlined_call_operand.hbm [shape: f32[128,256], index: 1, kind: input, shape index: {}]   ;;  %s1751_s2 = inlined_call_operand.hbm [shape: f32[128,256], index: 2, kind: input, shape index: {}]   ;;  %s1752_s3 = inlined_call_operand.hbm [shape: f32[128,256], index: 3, kind: input, shape index: {}]   ;;  %s1753_s4 = inlined_call_operand.hbm [shape: f32[128,256], index: 4, kind: input, shape index: {}]   ;;  %s1754_s5 = inlined_call_operand.hbm [shape: f32[128,256], index: 5, kind: output, shape index: {0}]   ;;  %s1755_s6 = inlined_call_operand.hbm [shape: f32[128,256], index: 6, kind: output, shape index: {1}]   ;;  %s1756_s7 = inlined_call_operand.hbm [shape: f32[128,256], index: 7, kind: output, shape index: {2}]   ;;  %s1757_s8 = inlined_call_operand.hbm [shape: f32[128,256], index: 8, kind: output, shape index: {3}]   ;;  %s1758_s9 = inlined_call_operand.hbm [shape: f32[128,256], index: 9, kind: output, shape index: {4}]  }
   0x1   :  { %16 = vsyncpa [#allocation6], 0 }
   0x2   :  { %17 = vsyncpa [#allocation9], 0 }
   0x3   :  { %18 = vsyncpa [#allocation4], 0 }
   0x4   :  { %19 = vsyncpa [#allocation13], 0 }
   0x5   :  { %20 = vsyncpa [#allocation16], 0  ;;  %s1009_s30 = smov [#allocation5]   ;;  %s1010_s11 = smov [#allocation8]  }
   0x6   :  { %s38_s10 = sshll.u32 %s1009_s30, 4  ;;  %s62_s12 = sshll.u32 %s1010_s11, 4  ;;  %s39_s10 = int_to_ptr.vmem [resolvable:$true] %s38_s10  ;;  %s63_s12 = int_to_ptr.vmem [resolvable:$true] %s62_s12 }
   0x7   :  { %s805_s13 = scalar_lea.vmem %s39_s10, 4096  ;;  %p810_p1 = scmp.lt.s32.totalorder %s39_s10, %s39_s10 }
   0x8   :  { %p806_p0 = scmp.ne.s32.totalorder %s39_s10, %s805_s13  ;;  %p811_p2 = scmp.lt.s32.totalorder %s805_s13, %s805_s13 }
   0xa   :  { %p812_p3 = por %p811_p2, %p810_p1 }
   0xc   :  { %p813_p4 = pnand %p812_p3, %p806_p0 }
   0xe   :  { %816 = shalt.err (!%p813_p4)
}
   0xf   :  { %s1011_s14 = smov 256   ;;  %s1012_s15 = smov 16  }
  0x10   :  { %44 = dma.hbm_to_vmem [thread:$0]  %s1750_s1, 4096, %s39_s10, [#allocation6], %s1011_s14, %s1011_s14, %s1012_s15  }
  0x11   :  { %s825_s18 = scalar_lea.vmem %s63_s12, 4096  ;;  %p830_p6 = scmp.lt.s32.totalorder %s63_s12, %s63_s12 }
  0x12   :  { %p826_p5 = scmp.ne.s32.totalorder %s63_s12, %s825_s18  ;;  %p831_p7 = scmp.lt.s32.totalorder %s825_s18, %s825_s18 }
  0x14   :  { %p832_p8 = por %p831_p7, %p830_p6 }
  0x16   :  { %p833_p9 = pnand %p832_p8, %p826_p5 }
  0x18   :  { %836 = shalt.err (!%p833_p9)
}
  0x19   :  { %68 = dma.hbm_to_vmem [thread:$0]  %s1752_s3, 4096, %s63_s12, [#allocation9], %s1011_s14, %s1011_s14, %s1012_s15  }
  0x1a   :  { %s1013_s21 = smov [#allocation2]   ;;  %s1014_s23 = smov [#allocation7]  }
  0x1b   :  { %s26_s22 = sshll.u32 %s1013_s21, 4  ;;  %s50_s24 = sshll.u32 %s1014_s23, 4  ;;  %s27_s22 = int_to_ptr.vmem [resolvable:$true] %s26_s22  ;;  %s51_s24 = int_to_ptr.vmem [resolvable:$true] %s50_s24 }
  0x1c   :  { %s845_s1 = scalar_lea.vmem %s27_s22, 4096  ;;  %p850_p11 = scmp.lt.s32.totalorder %s27_s22, %s27_s22 }
  0x1d   :  { %p846_p10 = scmp.ne.s32.totalorder %s27_s22, %s845_s1  ;;  %p851_p12 = scmp.lt.s32.totalorder %s845_s1, %s845_s1 }
  0x1f   :  { %p852_p13 = por %p851_p12, %p850_p11 }
  0x21   :  { %p853_p0 = pnand %p852_p13, %p846_p10 }
  0x23   :  { %856 = shalt.err (!%p853_p0)
}
  0x24   :  { %32 = dma.hbm_to_vmem [thread:$0]  %s1749_s0, 4096, %s27_s22, [#allocation3], %s1011_s14, %s1011_s14, %s1012_s15  }
  0x25   :  { %s865_s3 = scalar_lea.vmem %s51_s24, 4096  ;;  %p870_p2 = scmp.lt.s32.totalorder %s51_s24, %s51_s24 }
  0x26   :  { %p866_p1 = scmp.ne.s32.totalorder %s51_s24, %s865_s3  ;;  %p871_p3 = scmp.lt.s32.totalorder %s865_s3, %s865_s3 }
  0x28   :  { %p872_p4 = por %p871_p3, %p870_p2 }
  0x2a   :  { %p873_p5 = pnand %p872_p4, %p866_p1 }
  0x2c   :  { %876 = shalt.err (!%p873_p5)
}
  0x2d   :  { %56 = dma.hbm_to_vmem [thread:$0]  %s1751_s2, 4096, %s51_s24, [#allocation6], %s1011_s14, %s1011_s14, %s1012_s15  }
  0x2e   :  { %s1015_s29 = smov [#allocation10]  }
  0x2f   :  { %s74_s30 = sshll.u32 %s1015_s29, 4  ;;  %s75_s30 = int_to_ptr.vmem [resolvable:$true] %s74_s30 }
  0x30   :  { %s885_s10 = scalar_lea.vmem %s75_s30, 4096  ;;  %p890_p7 = scmp.lt.s32.totalorder %s75_s30, %s75_s30 }
  0x31   :  { %p886_p6 = scmp.ne.s32.totalorder %s75_s30, %s885_s10  ;;  %p891_p8 = scmp.lt.s32.totalorder %s885_s10, %s885_s10 }
  0x33   :  { %p892_p9 = por %p891_p8, %p890_p7 }
  0x35   :  { %p893_p10 = pnand %p892_p9, %p886_p6 }
  0x37   :  { %896 = shalt.err (!%p893_p10)
}
  0x38   :  { %80 = dma.hbm_to_vmem [thread:$0]  %s1753_s4, 4096, %s75_s30, [#allocation9], %s1011_s14, %s1011_s14, %s1012_s15  }
  0x39   :  { %997 = dma.done.wait [#allocation3], 4096  }
  0x3a   :  { %998 = vsyncadd [#allocation3], 4294963200 }
  0x3b   :  { %999 = dma.done.wait [#allocation6], 8192  }
  0x3c   :  { %1000 = vsyncadd [#allocation6], 4294959104 }
  0x3d   :  { %1001 = dma.done.wait [#allocation9], 8192  }
  0x3e   :  { %1002 = vsyncadd [#allocation9], 4294959104  ;;  %v160_v0 = vld [vmem:[#allocation7] sm:$0xff]  ;;  %v161_v2 = vld [vmem:[#allocation7 + $0x8] sm:$0xff]  ;;  %s1016_s2 = smov [#allocation12]  }
  0x3f   :  { %v1101_v1 = vld [vmem:[#allocation8] sm:$0xff]  ;;  %v1104_v4 = vld [vmem:[#allocation8 + $0x8] sm:$0xff]  ;;  %v162_v5 = vld [vmem:[#allocation7 + $0x10] sm:$0xff]  ;;  %s1200_s4 = sshll.u32 %s1016_s2, 4  ;;  %s1314_s4 = int_to_ptr.vmem [resolvable:$true] %s1200_s4 }
  0x40   :  { %v320_v3 = vsub.f32 %v160_v0, %v1101_v1  ;;  %v1106_v6 = vld [vmem:[#allocation8 + $0x10] sm:$0xff]  ;;  %v321_v7 = vsub.f32 %v161_v2, %v1104_v4  ;;  %v163_v9 = vld [vmem:[#allocation7 + $0x18] sm:$0xff]  ;;  %v164_v11 = vld [vmem:[#allocation7 + $0x20] sm:$0xff]  ;;  %s897_s12 = scalar_lea.vmem %s1314_s4, 4096  ;;  %p902_p12 = scmp.lt.s32.totalorder %s1314_s4, %s1314_s4 }
  0x41   :  { %v322_v8 = vsub.f32 %v162_v5, %v1106_v6  ;;  %v1110_v10 = vld [vmem:[#allocation8 + $0x18] sm:$0xff]  ;;  %v1113_v13 = vld [vmem:[#allocation8 + $0x20] sm:$0xff]  ;;  %v165_v14 = vld [vmem:[#allocation7 + $0x28] sm:$0xff]  ;;  %p898_p11 = scmp.ne.s32.totalorder %s1314_s4, %s897_s12  ;;  %p903_p13 = scmp.lt.s32.totalorder %s897_s12, %s897_s12 }
  0x42   :  { %352 = vst [vmem:[#allocation12] sm:$0xff] %v320_v3  ;;  %v323_v12 = vsub.f32 %v163_v9, %v1110_v10  ;;  %v1115_v15 = vld [vmem:[#allocation8 + $0x28] sm:$0xff]  ;;  %353 = vst [vmem:[#allocation12 + $0x8] sm:$0xff] %v321_v7  ;;  %v324_v16 = vsub.f32 %v164_v11, %v1113_v13  ;;  %v166_v18 = vld [vmem:[#allocation7 + $0x30] sm:$0xff] }
  0x43   :  { %354 = vst [vmem:[#allocation12 + $0x10] sm:$0xff] %v322_v8  ;;  %v325_v17 = vsub.f32 %v165_v14, %v1115_v15  ;;  %v1119_v19 = vld [vmem:[#allocation8 + $0x30] sm:$0xff]  ;;  %v167_v20 = vld [vmem:[#allocation7 + $0x38] sm:$0xff]  ;;  %v168_v23 = vld [vmem:[#allocation7 + $0x40] sm:$0xff]  ;;  %p904_p0 = por %p903_p13, %p902_p12 }
  0x44   :  { %355 = vst [vmem:[#allocation12 + $0x18] sm:$0xff] %v323_v12  ;;  %v326_v21 = vsub.f32 %v166_v18, %v1119_v19  ;;  %v1122_v22 = vld [vmem:[#allocation8 + $0x38] sm:$0xff]  ;;  %v1124_v24 = vld [vmem:[#allocation8 + $0x40] sm:$0xff]  ;;  %356 = vst [vmem:[#allocation12 + $0x20] sm:$0xff] %v324_v16 }
  0x45   :  { %357 = vst [vmem:[#allocation12 + $0x28] sm:$0xff] %v325_v17  ;;  %v327_v25 = vsub.f32 %v167_v20, %v1122_v22  ;;  %v328_v26 = vsub.f32 %v168_v23, %v1124_v24  ;;  %v169_v27 = vld [vmem:[#allocation7 + $0x48] sm:$0xff]  ;;  %v170_v29 = vld [vmem:[#allocation7 + $0x50] sm:$0xff]  ;;  %v171_v32 = vld [vmem:[#allocation7 + $0x58] sm:$0xff]  ;;  %p905_p1 = pnand %p904_p0, %p898_p11 }
  0x46   :  { %v1128_v28 = vld [vmem:[#allocation8 + $0x48] sm:$0xff]  ;;  %358 = vst [vmem:[#allocation12 + $0x30] sm:$0xff] %v326_v21  ;;  %v1131_v31 = vld [vmem:[#allocation8 + $0x50] sm:$0xff]  ;;  %v1133_v33 = vld [vmem:[#allocation8 + $0x58] sm:$0xff] }
  0x47   :  { %v329_v30 = vsub.f32 %v169_v27, %v1128_v28  ;;  %359 = vst [vmem:[#allocation12 + $0x38] sm:$0xff] %v327_v25  ;;  %360 = vst [vmem:[#allocation12 + $0x40] sm:$0xff] %v328_v26  ;;  %v330_v34 = vsub.f32 %v170_v29, %v1131_v31  ;;  %v331_v35 = vsub.f32 %v171_v32, %v1133_v33  ;;  %v172_v36 = vld [vmem:[#allocation7 + $0x60] sm:$0xff]  ;;  %v173_v38 = vld [vmem:[#allocation7 + $0x68] sm:$0xff] }
  0x48   :  { %v1137_v37 = vld [vmem:[#allocation8 + $0x60] sm:$0xff]  ;;  %v1140_v40 = vld [vmem:[#allocation8 + $0x68] sm:$0xff]  ;;  %v174_v41 = vld [vmem:[#allocation7 + $0x70] sm:$0xff] }
  0x49   :  { %361 = vst [vmem:[#allocation12 + $0x48] sm:$0xff] %v329_v30  ;;  %v332_v39 = vsub.f32 %v172_v36, %v1137_v37  ;;  %v1142_v42 = vld [vmem:[#allocation8 + $0x70] sm:$0xff]  ;;  %362 = vst [vmem:[#allocation12 + $0x50] sm:$0xff] %v330_v34  ;;  %v333_v43 = vsub.f32 %v173_v38, %v1140_v40  ;;  %v175_v45 = vld [vmem:[#allocation7 + $0x78] sm:$0xff] }
  0x4a   :  { %363 = vst [vmem:[#allocation12 + $0x58] sm:$0xff] %v331_v35  ;;  %v334_v44 = vsub.f32 %v174_v41, %v1142_v42  ;;  %v1146_v46 = vld [vmem:[#allocation8 + $0x78] sm:$0xff]  ;;  %v176_v47 = vld [vmem:[#allocation7 + $0x80] sm:$0xff]  ;;  %v177_v50 = vld [vmem:[#allocation7 + $0x88] sm:$0xff] }
  0x4b   :  { %364 = vst [vmem:[#allocation12 + $0x60] sm:$0xff] %v332_v39  ;;  %v335_v48 = vsub.f32 %v175_v45, %v1146_v46  ;;  %v1149_v49 = vld [vmem:[#allocation8 + $0x80] sm:$0xff]  ;;  %v1151_v51 = vld [vmem:[#allocation8 + $0x88] sm:$0xff]  ;;  %365 = vst [vmem:[#allocation12 + $0x68] sm:$0xff] %v333_v43 }
  0x4c   :  { %366 = vst [vmem:[#allocation12 + $0x70] sm:$0xff] %v334_v44  ;;  %v336_v52 = vsub.f32 %v176_v47, %v1149_v49  ;;  %v337_v53 = vsub.f32 %v177_v50, %v1151_v51  ;;  %v178_v54 = vld [vmem:[#allocation7 + $0x90] sm:$0xff]  ;;  %v179_v56 = vld [vmem:[#allocation7 + $0x98] sm:$0xff]  ;;  %v180_v59 = vld [vmem:[#allocation7 + $0xa0] sm:$0xff] }
  0x4d   :  { %v1155_v55 = vld [vmem:[#allocation8 + $0x90] sm:$0xff]  ;;  %367 = vst [vmem:[#allocation12 + $0x78] sm:$0xff] %v335_v48  ;;  %v1158_v58 = vld [vmem:[#allocation8 + $0x98] sm:$0xff]  ;;  %v1160_v60 = vld [vmem:[#allocation8 + $0xa0] sm:$0xff] }
  0x4e   :  { %v338_v57 = vsub.f32 %v178_v54, %v1155_v55  ;;  %1798 = vst [vmem:[#allocation24_spill] sm:$0xff] %v1160_v60  ;;  %368 = vst [vmem:[#allocation12 + $0x80] sm:$0xff] %v336_v52  ;;  %v339_v61 = vsub.f32 %v179_v56, %v1158_v58  ;;  %v340_v62 = vsub.f32 %v180_v59, %v1160_v60  ;;  %v181_v63 = vld [vmem:[#allocation7 + $0xa8] sm:$0xff]  ;;  %v182_v2 = vld [vmem:[#allocation7 + $0xb0] sm:$0xff] }
  0x4f   :  { %369 = vst [vmem:[#allocation12 + $0x88] sm:$0xff] %v337_v53  ;;  %v1164_v0 = vld [vmem:[#allocation8 + $0xa8] sm:$0xff]  ;;  %v1167_v5 = vld [vmem:[#allocation8 + $0xb0] sm:$0xff]  ;;  %v183_v7 = vld [vmem:[#allocation7 + $0xb8] sm:$0xff] }
  0x50   :  { %1799 = vst [vmem:[#allocation25_spill] sm:$0xff] %v1164_v0  ;;  %370 = vst [vmem:[#allocation12 + $0x90] sm:$0xff] %v338_v57  ;;  %v341_v3 = vsub.f32 %v181_v63, %v1164_v0  ;;  %v1169_v8 = vld [vmem:[#allocation8 + $0xb8] sm:$0xff]  ;;  %v342_v9 = vsub.f32 %v182_v2, %v1167_v5  ;;  %v184_v12 = vld [vmem:[#allocation7 + $0xc0] sm:$0xff] }
  0x51   :  { %1800 = vst [vmem:[#allocation26_spill] sm:$0xff] %v1167_v5  ;;  %1801 = vst [vmem:[#allocation27_spill] sm:$0xff] %v1169_v8  ;;  %v343_v11 = vsub.f32 %v183_v7, %v1169_v8  ;;  %v1173_v14 = vld [vmem:[#allocation8 + $0xc0] sm:$0xff]  ;;  %v185_v16 = vld [vmem:[#allocation7 + $0xc8] sm:$0xff] }
  0x52   :  { %371 = vst [vmem:[#allocation12 + $0x98] sm:$0xff] %v339_v61  ;;  %372 = vst [vmem:[#allocation12 + $0xa0] sm:$0xff] %v340_v62  ;;  %v344_v17 = vsub.f32 %v184_v12, %v1173_v14  ;;  %v1176_v18 = vld [vmem:[#allocation8 + $0xc8] sm:$0xff]  ;;  %v186_v20 = vld [vmem:[#allocation7 + $0xd0] sm:$0xff] }
  0x53   :  { %1802 = vst [vmem:[#allocation28_spill] sm:$0xff] %v1173_v14  ;;  %373 = vst [vmem:[#allocation12 + $0xa8] sm:$0xff] %v341_v3  ;;  %v1178_v21 = vld [vmem:[#allocation8 + $0xd0] sm:$0xff]  ;;  %v345_v23 = vsub.f32 %v185_v16, %v1176_v18  ;;  %v187_v26 = vld [vmem:[#allocation7 + $0xd8] sm:$0xff] }
  0x54   :  { %1803 = vst [vmem:[#allocation29_spill] sm:$0xff] %v1176_v18  ;;  %1804 = vst [vmem:[#allocation30_spill] sm:$0xff] %v1178_v21  ;;  %v346_v25 = vsub.f32 %v186_v20, %v1178_v21  ;;  %v1182_v27 = vld [vmem:[#allocation8 + $0xd8] sm:$0xff]  ;;  %v188_v29 = vld [vmem:[#allocation7 + $0xe0] sm:$0xff] }
  0x55   :  { %374 = vst [vmem:[#allocation12 + $0xb0] sm:$0xff] %v342_v9  ;;  %375 = vst [vmem:[#allocation12 + $0xb8] sm:$0xff] %v343_v11  ;;  %v347_v30 = vsub.f32 %v187_v26, %v1182_v27  ;;  %v1185_v32 = vld [vmem:[#allocation8 + $0xe0] sm:$0xff]  ;;  %v189_v34 = vld [vmem:[#allocation7 + $0xe8] sm:$0xff] }
  0x56   :  { %1805 = vst [vmem:[#allocation31_spill] sm:$0xff] %v1182_v27  ;;  %376 = vst [vmem:[#allocation12 + $0xc0] sm:$0xff] %v344_v17  ;;  %v1187_v35 = vld [vmem:[#allocation8 + $0xe8] sm:$0xff]  ;;  %v348_v36 = vsub.f32 %v188_v29, %v1185_v32  ;;  %v190_v39 = vld [vmem:[#allocation7 + $0xf0] sm:$0xff] }
  0x57   :  { %1806 = vst [vmem:[#allocation32_spill] sm:$0xff] %v1185_v32  ;;  %1807 = vst [vmem:[#allocation33_spill] sm:$0xff] %v1187_v35  ;;  %v349_v38 = vsub.f32 %v189_v34, %v1187_v35  ;;  %v1191_v41 = vld [vmem:[#allocation8 + $0xf0] sm:$0xff]  ;;  %v191_v43 = vld [vmem:[#allocation7 + $0xf8] sm:$0xff] }
  0x58   :  { %377 = vst [vmem:[#allocation12 + $0xc8] sm:$0xff] %v345_v23  ;;  %378 = vst [vmem:[#allocation12 + $0xd0] sm:$0xff] %v346_v25  ;;  %v350_v44 = vsub.f32 %v190_v39, %v1191_v41  ;;  %v1194_v45 = vld [vmem:[#allocation8 + $0xf8] sm:$0xff]  ;;  %v1196_v47 = vld [vmem:[#allocation10] sm:$0xff] }
  0x59   :  { %1808 = vst [vmem:[#allocation34_spill] sm:$0xff] %v1191_v41  ;;  %379 = vst [vmem:[#allocation12 + $0xd8] sm:$0xff] %v347_v30  ;;  %v1198_v48 = vld [vmem:[#allocation10 + $0x8] sm:$0xff]  ;;  %v351_v50 = vsub.f32 %v191_v43, %v1194_v45  ;;  %v448_v52 = vadd.f32 1e-05, %v1196_v47  ;;  %v1205_v54 = vld [vmem:[#allocation10 + $0x10] sm:$0xff] }
  0x5a   :  { %1809 = vst [vmem:[#allocation35_spill] sm:$0xff] %v1194_v45  ;;  %380 = vst [vmem:[#allocation12 + $0xe0] sm:$0xff] %v348_v36  ;;  %v449_v53 = vadd.f32 1e-05, %v1198_v48  ;;  %v1207_v56 = vld [vmem:[#allocation10 + $0x18] sm:$0xff]  ;;  %v1211_v61 = vld [vmem:[#allocation10 + $0x20] sm:$0xff] }
  0x5b   :  { %381 = vst [vmem:[#allocation12 + $0xe8] sm:$0xff] %v349_v38  ;;  %382 = vst [vmem:[#allocation12 + $0xf0] sm:$0xff] %v350_v44  ;;  %v450_v57 = vadd.f32 1e-05, %v1205_v54  ;;  %v451_v59 = vadd.f32 1e-05, %v1207_v56  ;;  %733 = vrcp.f32 %v448_v52 }
  0x5c   :  { %v1213_v62 = vld [vmem:[#allocation10 + $0x28] sm:$0xff]  ;;  %383 = vst [vmem:[#allocation12 + $0xf8] sm:$0xff] %v351_v50  ;;  %v452_v63 = vadd.f32 1e-05, %v1211_v61  ;;  %v1217_v3 = vld [vmem:[#allocation10 + $0x30] sm:$0xff]  ;;  %v1219_v7 = vld [vmem:[#allocation10 + $0x38] sm:$0xff]  ;;  %735 = vrcp.f32 %v449_v53 }
  0x5d   :  { %v453_v2 = vadd.f32 1e-05, %v1213_v62  ;;  %v454_v9 = vadd.f32 1e-05, %v1217_v3  ;;  %v455_v11 = vadd.f32 1e-05, %v1219_v7  ;;  %737 = vrcp.f32 %v450_v57 }
  0x5e   :  { %v1223_v12 = vld [vmem:[#allocation10 + $0x40] sm:$0xff]  ;;  %v1225_v16 = vld [vmem:[#allocation10 + $0x48] sm:$0xff]  ;;  %v1229_v23 = vld [vmem:[#allocation10 + $0x50] sm:$0xff]  ;;  %739 = vrcp.f32 %v451_v59 }
  0x5f   :  { %v456_v17 = vadd.f32 1e-05, %v1223_v12  ;;  %v457_v20 = vadd.f32 1e-05, %v1225_v16  ;;  %v1231_v25 = vld [vmem:[#allocation10 + $0x58] sm:$0xff]  ;;  %v1235_v30 = vld [vmem:[#allocation10 + $0x60] sm:$0xff]  ;;  %741 = vrcp.f32 %v452_v63 }
  0x60   :  { %1810 = vst [vmem:[#allocation36_spill] sm:$0xff] %v1231_v25  ;;  %v458_v26 = vadd.f32 1e-05, %v1229_v23  ;;  %v459_v29 = vadd.f32 1e-05, %v1231_v25  ;;  %1811 = vst [vmem:[#allocation37_spill] sm:$0xff] %v1235_v30  ;;  %743 = vrcp.f32 %v453_v2 }
  0x61   :  { %v1237_v34 = vld [vmem:[#allocation10 + $0x68] sm:$0xff]  ;;  %v460_v36 = vadd.f32 1e-05, %v1235_v30  ;;  %v1241_v39 = vld [vmem:[#allocation10 + $0x70] sm:$0xff]  ;;  %v1243_v43 = vld [vmem:[#allocation10 + $0x78] sm:$0xff]  ;;  %745 = vrcp.f32 %v454_v9 }
  0x62   :  { %1812 = vst [vmem:[#allocation38_spill] sm:$0xff] %v1237_v34  ;;  %v461_v38 = vadd.f32 1e-05, %v1237_v34  ;;  %1813 = vst [vmem:[#allocation39_spill] sm:$0xff] %v1241_v39  ;;  %v462_v44 = vadd.f32 1e-05, %v1241_v39  ;;  %747 = vrcp.f32 %v455_v11 }
  0x63   :  { %1814 = vst [vmem:[#allocation40_spill] sm:$0xff] %v1243_v43  ;;  %v1247_v50 = vadd.f32 1e-05, %v1243_v43  ;;  %v1249_v52 = vld [vmem:[#allocation10 + $0x80] sm:$0xff]  ;;  %v1251_v53 = vld [vmem:[#allocation10 + $0x88] sm:$0xff]  ;;  %v1259_v63 = vld [vmem:[#allocation10 + $0x90] sm:$0xff]  ;;  %749 = vrcp.f32 %v456_v17 }
  0x64   :  { %1815 = vst [vmem:[#allocation41_spill] sm:$0xff] %v1249_v52  ;;  %1816 = vst [vmem:[#allocation42_spill] sm:$0xff] %v1251_v53  ;;  %v1254_v57 = vadd.f32 1e-05, %v1249_v52  ;;  %v1257_v59 = vadd.f32 1e-05, %v1251_v53  ;;  %751 = vrcp.f32 %v457_v20 }
  0x65   :  { %1817 = vst [vmem:[#allocation43_spill] sm:$0xff] %v1259_v63  ;;  %v1261_v45 = vld [vmem:[#allocation10 + $0x98] sm:$0xff]  ;;  %v1264_v2 = vadd.f32 1e-05, %v1259_v63  ;;  %v1269_v35 = vld [vmem:[#allocation10 + $0xa0] sm:$0xff]  ;;  %v1271_v9 = vld [vmem:[#allocation10 + $0xa8] sm:$0xff]  ;;  %753 = vrcp.f32 %v458_v26 }
  0x66   :  { %1818 = vst [vmem:[#allocation44_spill] sm:$0xff] %v1261_v45  ;;  %v1267_v41 = vadd.f32 1e-05, %v1261_v45  ;;  %1819 = vst [vmem:[#allocation45_spill] sm:$0xff] %v1269_v35  ;;  %v1274_v32 = vadd.f32 1e-05, %v1269_v35  ;;  %755 = vrcp.f32 %v459_v29 }
  0x67   :  { %1820 = vst [vmem:[#allocation46_spill] sm:$0xff] %v1271_v9  ;;  %v1277_v27 = vadd.f32 1e-05, %v1271_v9  ;;  %v1279_v21 = vld [vmem:[#allocation10 + $0xb0] sm:$0xff]  ;;  %v1281_v11 = vld [vmem:[#allocation10 + $0xb8] sm:$0xff]  ;;  %v1289_v45 = vld [vmem:[#allocation10 + $0xc0] sm:$0xff]  ;;  %757 = vrcp.f32 %v460_v36 }
  0x68   :  { %1821 = vst [vmem:[#allocation47_spill] sm:$0xff] %v1279_v21  ;;  %1822 = vst [vmem:[#allocation48_spill] sm:$0xff] %v1281_v11  ;;  %v1284_v18 = vadd.f32 1e-05, %v1279_v21  ;;  %v1287_v14 = vadd.f32 1e-05, %v1281_v11  ;;  %759 = vrcp.f32 %v461_v38 }
  0x69   :  { %1823 = vst [vmem:[#allocation49_spill] sm:$0xff] %v1289_v45  ;;  %v1291_v17 = vld [vmem:[#allocation10 + $0xc8] sm:$0xff]  ;;  %v1294_v9 = vadd.f32 1e-05, %v1289_v45  ;;  %v1299_v8 = vld [vmem:[#allocation10 + $0xd0] sm:$0xff]  ;;  %v1301_v20 = vld [vmem:[#allocation10 + $0xd8] sm:$0xff]  ;;  %761 = vrcp.f32 %v462_v44 }
  0x6a   :  { %1824 = vst [vmem:[#allocation50_spill] sm:$0xff] %v1291_v17  ;;  %v1297_v35 = vadd.f32 1e-05, %v1291_v17  ;;  %1825 = vst [vmem:[#allocation51_spill] sm:$0xff] %v1299_v8  ;;  %v1304_v21 = vadd.f32 1e-05, %v1299_v8 }
  0x6b   :  { %1826 = vst [vmem:[#allocation52_spill] sm:$0xff] %v1301_v20  ;;  %v1307_v11 = vadd.f32 1e-05, %v1301_v20  ;;  %v1309_v63 = vld [vmem:[#allocation10 + $0xe0] sm:$0xff]  ;;  %v1311_v26 = vld [vmem:[#allocation10 + $0xe8] sm:$0xff]  ;;  %v1322_v29 = vld [vmem:[#allocation10 + $0xf0] sm:$0xff]  ;;  %v734_v20 = vpop.eup %733 }
  0x6c   :  { %1827 = vst [vmem:[#allocation53_spill] sm:$0xff] %v1309_v63  ;;  %1828 = vst [vmem:[#allocation54_spill] sm:$0xff] %v1311_v26  ;;  %v1317_v17 = vadd.f32 1e-05, %v1309_v63  ;;  %v1320_v45 = vadd.f32 1e-05, %v1311_v26  ;;  %v736_v26 = vpop.eup %735  ;;  %v481_v5 = vmul.f32 %v734_v20, %v1101_v1 }
  0x6d   :  { %1829 = vst [vmem:[#allocation55_spill] sm:$0xff] %v1322_v29  ;;  %v1324_v8 = vld [vmem:[#allocation10 + $0xf8] sm:$0xff]  ;;  %v1327_v53 = vadd.f32 1e-05, %v1322_v29  ;;  %v96_v63 = vld [vmem:[#allocation2] sm:$0xff]  ;;  %v97_v39 = vld [vmem:[#allocation2 + $0x8] sm:$0xff] }
  0x6e   :  { %1830 = vst [vmem:[#allocation56_spill] sm:$0xff] %v1324_v8  ;;  %v1330_v36 = vadd.f32 1e-05, %v1324_v8  ;;  %v1332_v52 = vld [vmem:[#allocation5] sm:$0xff]  ;;  %v1336_v0 = vld [vmem:[#allocation5 + $0x8] sm:$0xff]  ;;  %v98_v34 = vld [vmem:[#allocation2 + $0x10] sm:$0xff]  ;;  %v384_v38 = vmul.f32 %v1196_v47, %v96_v63 }
  0x6f   :  { %1831 = vst [vmem:[#allocation57_spill] sm:$0xff] %v1332_v52  ;;  %v256_v43 = vadd.f32 %v1332_v52, %v96_v63  ;;  %1832 = vst [vmem:[#allocation58_spill] sm:$0xff] %v1336_v0 }
  0x70   :  { %908 = shalt.err (!%p905_p1)
}
  0x71   :  { %663 = dma.vmem_to_hbm [thread:$0]  %s1314_s4, 4096, %s1755_s6, [#allocation13], %s1011_s14, %s1011_s14, %s1012_s15   ;;  %v738_v1 = vpop.eup %737  ;;  %v483_v44 = vmul.f32 %v736_v26, %v1104_v4  ;;  %763 = vrcp.f32 %v1247_v50  ;;  %v257_v47 = vadd.f32 %v1336_v0, %v97_v39  ;;  %v1353_v63 = vld [vmem:[#allocation5 + $0x10] sm:$0xff]  ;;  %v99_v20 = vld [vmem:[#allocation2 + $0x18] sm:$0xff]  ;;  %v385_v8 = vmul.f32 %v1198_v48, %v97_v39  ;;  %544 = vst [vmem:[#allocation15] sm:$0xff] %v481_v5  ;;  %288 = vst [vmem:[#allocation11] sm:$0xff] %v256_v43 }
  0x72   :  { %v1355_v52 = vld [vmem:[#allocation5 + $0x18] sm:$0xff]  ;;  %v740_v29 = vpop.eup %739  ;;  %v485_v60 = vmul.f32 %v738_v1, %v1106_v6  ;;  %765 = vrcp.f32 %v1254_v57  ;;  %v258_v4 = vadd.f32 %v1353_v63, %v98_v34  ;;  %v100_v26 = vld [vmem:[#allocation2 + $0x20] sm:$0xff]  ;;  %v1364_v30 = vld [vmem:[#allocation2 + $0x28] sm:$0xff]  ;;  %416 = vst [vmem:[#allocation14] sm:$0xff] %v384_v38  ;;  %v386_v57 = vmul.f32 %v1205_v54, %v98_v34  ;;  %s1017_s6 = smov [#allocation11]   ;;  %s1018_s18 = smov [#allocation14]  }
  0x73   :  { %v259_v50 = vadd.f32 %v1355_v52, %v99_v20  ;;  %v1362_v0 = vld [vmem:[#allocation5 + $0x20] sm:$0xff]  ;;  %v742_v25 = vpop.eup %741  ;;  %545 = vst [vmem:[#allocation15 + $0x8] sm:$0xff] %v483_v44  ;;  %v487_v48 = vmul.f32 %v740_v29, %v1110_v10  ;;  %767 = vrcp.f32 %v1257_v59  ;;  %289 = vst [vmem:[#allocation11 + $0x8] sm:$0xff] %v257_v47  ;;  %v1369_v5 = vld [vmem:[#allocation5 + $0x28] sm:$0xff]  ;;  %v387_v47 = vmul.f32 %v1207_v56, %v99_v20  ;;  %s1555_s17 = sshll.u32 %s1017_s6, 4  ;;  %s1605_s19 = sshll.u32 %s1018_s18, 4  ;;  %s1589_s17 = int_to_ptr.vmem [resolvable:$true] %s1555_s17  ;;  %s1647_s19 = int_to_ptr.vmem [resolvable:$true] %s1605_s19 }
  0x74   :  { %v260_v6 = vadd.f32 %v1362_v0, %v100_v26  ;;  %v1371_v39 = vld [vmem:[#allocation2 + $0x30] sm:$0xff]  ;;  %417 = vst [vmem:[#allocation14 + $0x8] sm:$0xff] %v385_v8  ;;  %v744_v1 = vpop.eup %743  ;;  %546 = vst [vmem:[#allocation15 + $0x10] sm:$0xff] %v485_v60  ;;  %v489_v38 = vmul.f32 %v742_v25, %v1113_v13  ;;  %769 = vrcp.f32 %v1264_v2  ;;  %v261_v10 = vadd.f32 %v1369_v5, %v1364_v30  ;;  %v1382_v29 = vld [vmem:[#allocation2 + $0x38] sm:$0xff]  ;;  %s917_s20 = scalar_lea.vmem %s1589_s17, 4096  ;;  %p922_p3 = scmp.lt.s32.totalorder %s1589_s17, %s1589_s17 }
  0x75   :  { %v1373_v43 = vld [vmem:[#allocation5 + $0x30] sm:$0xff]  ;;  %290 = vst [vmem:[#allocation11 + $0x10] sm:$0xff] %v258_v4  ;;  %291 = vst [vmem:[#allocation11 + $0x18] sm:$0xff] %v259_v50  ;;  %v1384_v44 = vld [vmem:[#allocation5 + $0x38] sm:$0xff]  ;;  %v746_v54 = vpop.eup %745  ;;  %v491_v13 = vmul.f32 %v744_v1, %v1115_v15  ;;  %771 = vrcp.f32 %v1267_v41  ;;  %p918_p2 = scmp.ne.s32.totalorder %s1589_s17, %s917_s20  ;;  %p923_p4 = scmp.lt.s32.totalorder %s917_s20, %s917_s20 }
  0x76   :  { %v262_v59 = vadd.f32 %v1373_v43, %v1371_v39  ;;  %v1386_v8 = vld [vmem:[#allocation2 + $0x40] sm:$0xff]  ;;  %547 = vst [vmem:[#allocation15 + $0x18] sm:$0xff] %v487_v48  ;;  %292 = vst [vmem:[#allocation11 + $0x20] sm:$0xff] %v260_v6  ;;  %v263_v60 = vadd.f32 %v1384_v44, %v1382_v29  ;;  %v1394_v34 = vld [vmem:[#allocation2 + $0x48] sm:$0xff]  ;;  %v748_v4 = vpop.eup %747  ;;  %v493_v50 = vmul.f32 %v746_v54, %v1119_v19  ;;  %773 = vrcp.f32 %v1274_v32 }
  0x77   :  { %v1392_v25 = vld [vmem:[#allocation5 + $0x40] sm:$0xff]  ;;  %v1396_v2 = vld [vmem:[#allocation5 + $0x48] sm:$0xff]  ;;  %418 = vst [vmem:[#allocation14 + $0x10] sm:$0xff] %v386_v57  ;;  %548 = vst [vmem:[#allocation15 + $0x20] sm:$0xff] %v489_v38  ;;  %v750_v56 = vpop.eup %749  ;;  %v495_v19 = vmul.f32 %v748_v4, %v1122_v22  ;;  %775 = vrcp.f32 %v1277_v27  ;;  %p924_p5 = por %p923_p4, %p922_p3 }
  0x78   :  { %293 = vst [vmem:[#allocation11 + $0x28] sm:$0xff] %v261_v10  ;;  %294 = vst [vmem:[#allocation11 + $0x30] sm:$0xff] %v262_v59  ;;  %v264_v15 = vadd.f32 %v1392_v25, %v1386_v8  ;;  %v265_v41 = vadd.f32 %v1396_v2, %v1394_v34  ;;  %v1405_v48 = vld [vmem:[#allocation2 + $0x50] sm:$0xff]  ;;  %v1409_v57 = vld [vmem:[#allocation2 + $0x58] sm:$0xff]  ;;  %v388_v10 = vmul.f32 %v1211_v61, %v100_v26  ;;  %v752_v59 = vpop.eup %751  ;;  %777 = vrcp.f32 %v1284_v18 }
  0x79   :  { %v1407_v6 = vld [vmem:[#allocation5 + $0x50] sm:$0xff]  ;;  %549 = vst [vmem:[#allocation15 + $0x28] sm:$0xff] %v491_v13  ;;  %295 = vst [vmem:[#allocation11 + $0x38] sm:$0xff] %v263_v60  ;;  %v1415_v20 = vld [vmem:[#allocation5 + $0x58] sm:$0xff]  ;;  %v497_v54 = vmul.f32 %v750_v56, %v1124_v24  ;;  %v754_v61 = vpop.eup %753  ;;  %v499_v24 = vmul.f32 %v752_v59, %v1128_v28  ;;  %779 = vrcp.f32 %v1287_v14  ;;  %p925_p6 = pnand %p924_p5, %p918_p2 }
  0x7a   :  { %v266_v32 = vadd.f32 %v1407_v6, %v1405_v48  ;;  %v1417_v1 = vld [vmem:[#allocation2 + $0x60] sm:$0xff]  ;;  %419 = vst [vmem:[#allocation14 + $0x18] sm:$0xff] %v387_v47  ;;  %550 = vst [vmem:[#allocation15 + $0x30] sm:$0xff] %v493_v50  ;;  %v267_v22 = vadd.f32 %v1415_v20, %v1409_v57  ;;  %v1428_v13 = vld [vmem:[#allocation2 + $0x68] sm:$0xff]  ;;  %v501_v28 = vmul.f32 %v754_v61, %v1131_v31  ;;  %781 = vrcp.f32 %v1294_v9 }
  0x7b   :  { %v1419_v38 = vld [vmem:[#allocation5 + $0x60] sm:$0xff]  ;;  %296 = vst [vmem:[#allocation11 + $0x40] sm:$0xff] %v264_v15  ;;  %297 = vst [vmem:[#allocation11 + $0x48] sm:$0xff] %v265_v41  ;;  %v1430_v60 = vld [vmem:[#allocation5 + $0x68] sm:$0xff]  ;;  %v389_v15 = vmul.f32 %v1213_v62, %v1364_v30  ;;  %v756_v41 = vpop.eup %755  ;;  %783 = vrcp.f32 %v1297_v35 }
  0x7c   :  { %v268_v27 = vadd.f32 %v1419_v38, %v1417_v1  ;;  %v1432_v47 = vld [vmem:[#allocation2 + $0x70] sm:$0xff]  ;;  %551 = vst [vmem:[#allocation15 + $0x38] sm:$0xff] %v495_v19  ;;  %298 = vst [vmem:[#allocation11 + $0x50] sm:$0xff] %v266_v32  ;;  %v269_v18 = vadd.f32 %v1430_v60, %v1428_v13  ;;  %v1440_v4 = vld [vmem:[#allocation2 + $0x78] sm:$0xff]  ;;  %v758_v62 = vpop.eup %757  ;;  %v503_v31 = vmul.f32 %v756_v41, %v1133_v33  ;;  %785 = vrcp.f32 %v1304_v21 }
  0x7d   :  { %v1438_v26 = vld [vmem:[#allocation5 + $0x70] sm:$0xff]  ;;  %v1442_v50 = vld [vmem:[#allocation5 + $0x78] sm:$0xff]  ;;  %420 = vst [vmem:[#allocation14 + $0x20] sm:$0xff] %v388_v10  ;;  %552 = vst [vmem:[#allocation15 + $0x40] sm:$0xff] %v497_v54  ;;  %v505_v33 = vmul.f32 %v758_v62, %v1137_v37  ;;  %787 = vrcp.f32 %v1307_v11 }
  0x7e   :  { %299 = vst [vmem:[#allocation11 + $0x58] sm:$0xff] %v267_v22  ;;  %300 = vst [vmem:[#allocation11 + $0x60] sm:$0xff] %v268_v27  ;;  %v270_v14 = vadd.f32 %v1438_v26, %v1432_v47  ;;  %v271_v56 = vadd.f32 %v1442_v50, %v1440_v4  ;;  %v1452_v19 = vld [vmem:[#allocation2 + $0x80] sm:$0xff]  ;;  %v1456_v10 = vld [vmem:[#allocation2 + $0x88] sm:$0xff]  ;;  %v390_v22 = vmul.f32 %v1217_v3, %v1371_v39  ;;  %v760_v27 = vpop.eup %759  ;;  %789 = vrcp.f32 %v1317_v17 }
  0x7f   :  { %v1454_v32 = vld [vmem:[#allocation5 + $0x80] sm:$0xff]  ;;  %553 = vst [vmem:[#allocation15 + $0x48] sm:$0xff] %v499_v24  ;;  %301 = vst [vmem:[#allocation11 + $0x68] sm:$0xff] %v269_v18  ;;  %v1462_v9 = vld [vmem:[#allocation5 + $0x88] sm:$0xff]  ;;  %v762_v3 = vpop.eup %761  ;;  %v507_v37 = vmul.f32 %v760_v27, %v1140_v40  ;;  %791 = vrcp.f32 %v1320_v45 }
  0x80   :  { %v272_v30 = vadd.f32 %v1454_v32, %v1452_v19  ;;  %v1464_v59 = vld [vmem:[#allocation2 + $0x90] sm:$0xff]  ;;  %421 = vst [vmem:[#allocation14 + $0x28] sm:$0xff] %v389_v15  ;;  %554 = vst [vmem:[#allocation15 + $0x50] sm:$0xff] %v501_v28  ;;  %v273_v35 = vadd.f32 %v1462_v9, %v1456_v10  ;;  %v1476_v24 = vld [vmem:[#allocation2 + $0x98] sm:$0xff]  ;;  %v509_v40 = vmul.f32 %v762_v3, %v1142_v42  ;;  %793 = vrcp.f32 %v1327_v53 }
  0x81   :  { %v1466_v54 = vld [vmem:[#allocation5 + $0x90] sm:$0xff]  ;;  %302 = vst [vmem:[#allocation11 + $0x70] sm:$0xff] %v270_v14  ;;  %303 = vst [vmem:[#allocation11 + $0x78] sm:$0xff] %v271_v56  ;;  %v1478_v18 = vld [vmem:[#allocation5 + $0x98] sm:$0xff]  ;;  %v391_v14 = vmul.f32 %v1219_v7, %v1382_v29  ;;  %v764_v56 = vpop.eup %763  ;;  %795 = vrcp.f32 %v1330_v36 }
  0x82   :  { %v274_v61 = vadd.f32 %v1466_v54, %v1464_v59  ;;  %v1480_v15 = vld [vmem:[#allocation2 + $0xa0] sm:$0xff]  ;;  %555 = vst [vmem:[#allocation15 + $0x58] sm:$0xff] %v503_v31  ;;  %304 = vst [vmem:[#allocation11 + $0x80] sm:$0xff] %v272_v30  ;;  %v275_v21 = vadd.f32 %v1478_v18, %v1476_v24  ;;  %v1488_v41 = vld [vmem:[#allocation2 + $0xa8] sm:$0xff]  ;;  %v766_v7 = vpop.eup %765  ;;  %v511_v42 = vmul.f32 %v764_v56, %v1146_v46 }
  0x83   :  { %v1486_v39 = vld [vmem:[#allocation5 + $0xa0] sm:$0xff]  ;;  %v1490_v28 = vld [vmem:[#allocation5 + $0xa8] sm:$0xff]  ;;  %422 = vst [vmem:[#allocation14 + $0x30] sm:$0xff] %v390_v22  ;;  %556 = vst [vmem:[#allocation15 + $0x60] sm:$0xff] %v505_v33  ;;  %v513_v46 = vmul.f32 %v766_v7, %v1149_v49 }
  0x84   :  { %305 = vst [vmem:[#allocation11 + $0x88] sm:$0xff] %v273_v35  ;;  %306 = vst [vmem:[#allocation11 + $0x90] sm:$0xff] %v274_v61  ;;  %v276_v11 = vadd.f32 %v1486_v39, %v1480_v15  ;;  %v277_v62 = vadd.f32 %v1490_v28, %v1488_v41  ;;  %v1500_v31 = vld [vmem:[#allocation2 + $0xb0] sm:$0xff]  ;;  %v1504_v22 = vld [vmem:[#allocation2 + $0xb8] sm:$0xff]  ;;  %v392_v35 = vmul.f32 %v1223_v12, %v1386_v8  ;;  %v768_v61 = vpop.eup %767 }
  0x85   :  { %v1502_v30 = vld [vmem:[#allocation5 + $0xb0] sm:$0xff]  ;;  %557 = vst [vmem:[#allocation15 + $0x68] sm:$0xff] %v507_v37  ;;  %307 = vst [vmem:[#allocation11 + $0x98] sm:$0xff] %v275_v21  ;;  %v1510_v29 = vld [vmem:[#allocation5 + $0xb8] sm:$0xff]  ;;  %v770_v12 = vpop.eup %769  ;;  %v515_v49 = vmul.f32 %v768_v61, %v1151_v51 }
  0x86   :  { %v278_v17 = vadd.f32 %v1502_v30, %v1500_v31  ;;  %v1512_v27 = vld [vmem:[#allocation2 + $0xc0] sm:$0xff]  ;;  %423 = vst [vmem:[#allocation14 + $0x38] sm:$0xff] %v391_v14  ;;  %558 = vst [vmem:[#allocation15 + $0x70] sm:$0xff] %v509_v40  ;;  %v279_v45 = vadd.f32 %v1510_v29, %v1504_v22  ;;  %v1524_v37 = vld [vmem:[#allocation2 + $0xc8] sm:$0xff]  ;;  %v517_v51 = vmul.f32 %v770_v12, %v1155_v55 }
  0x87   :  { %v1514_v33 = vld [vmem:[#allocation5 + $0xc0] sm:$0xff]  ;;  %308 = vst [vmem:[#allocation11 + $0xa0] sm:$0xff] %v276_v11  ;;  %309 = vst [vmem:[#allocation11 + $0xa8] sm:$0xff] %v277_v62  ;;  %v1526_v21 = vld [vmem:[#allocation5 + $0xc8] sm:$0xff]  ;;  %v393_v11 = vmul.f32 %v1225_v16, %v1394_v34  ;;  %v772_v62 = vpop.eup %771  ;;  %v394_v16 = vmul.f32 %v1229_v23, %v1405_v48 }
  0x88   :  { %v280_v3 = vadd.f32 %v1514_v33, %v1512_v27  ;;  %v1528_v14 = vld [vmem:[#allocation2 + $0xd0] sm:$0xff]  ;;  %559 = vst [vmem:[#allocation15 + $0x78] sm:$0xff] %v511_v42  ;;  %310 = vst [vmem:[#allocation11 + $0xb0] sm:$0xff] %v278_v17  ;;  %v281_v53 = vadd.f32 %v1526_v21, %v1524_v37  ;;  %v1536_v56 = vld [vmem:[#allocation2 + $0xd8] sm:$0xff]  ;;  %v774_v55 = vpop.eup %773  ;;  %v519_v34 = vmul.f32 %v772_v62, %v1158_v58 }
  0x89   :  { %v1534_v8 = vld [vmem:[#allocation5 + $0xd0] sm:$0xff]  ;;  %v1538_v40 = vld [vmem:[#allocation5 + $0xd8] sm:$0xff]  ;;  %424 = vst [vmem:[#allocation14 + $0x40] sm:$0xff] %v392_v35  ;;  %560 = vst [vmem:[#allocation15 + $0x80] sm:$0xff] %v513_v46 }
  0x8a   :  { %1833 = vst [vmem:[#allocation59_spill] sm:$0xff] %v1534_v8  ;;  %1834 = vst [vmem:[#allocation60_spill] sm:$0xff] %v1538_v40  ;;  %v282_v36 = vadd.f32 %v1534_v8, %v1528_v14  ;;  %v283_v7 = vadd.f32 %v1538_v40, %v1536_v56  ;;  %v1547_v42 = vld [vmem:[#allocation2 + $0xe0] sm:$0xff]  ;;  %v1551_v35 = vld [vmem:[#allocation2 + $0xe8] sm:$0xff] }
  0x8b   :  { %311 = vst [vmem:[#allocation11 + $0xb8] sm:$0xff] %v279_v45  ;;  %312 = vst [vmem:[#allocation11 + $0xc0] sm:$0xff] %v280_v3  ;;  %v1549_v17 = vld [vmem:[#allocation5 + $0xe0] sm:$0xff]  ;;  %v1560_v46 = vld [vmem:[#allocation5 + $0xe8] sm:$0xff] }
  0x8c   :  { %1835 = vst [vmem:[#allocation61_spill] sm:$0xff] %v1549_v17  ;;  %561 = vst [vmem:[#allocation15 + $0x88] sm:$0xff] %v515_v49  ;;  %v284_v61 = vadd.f32 %v1549_v17, %v1547_v42  ;;  %v1562_v45 = vld [vmem:[#allocation2 + $0xf0] sm:$0xff]  ;;  %v1837_v23 = vld [vmem:[#allocation36_spill] sm:$0xff]  ;;  %v776_v49 = vpop.eup %775  ;;  %v285_v62 = vadd.f32 %v1560_v46, %v1551_v35 }
  0x8d   :  { %313 = vst [vmem:[#allocation11 + $0xc8] sm:$0xff] %v281_v53  ;;  %v1564_v3 = vld [vmem:[#allocation5 + $0xf0] sm:$0xff]  ;;  %425 = vst [vmem:[#allocation14 + $0x48] sm:$0xff] %v393_v11  ;;  %v395_v48 = vmul.f32 %v1837_v23, %v1409_v57  ;;  %v1838_v12 = vld [vmem:[#allocation37_spill] sm:$0xff] }
  0x8e   :  { %1836 = vst [vmem:[#allocation62_spill] sm:$0xff] %v1564_v3  ;;  %v396_v40 = vmul.f32 %v1838_v12, %v1417_v1  ;;  %562 = vst [vmem:[#allocation15 + $0x90] sm:$0xff] %v517_v51  ;;  %v1839_v58 = vld [vmem:[#allocation24_spill] sm:$0xff]  ;;  %v286_v17 = vadd.f32 %v1564_v3, %v1562_v45  ;;  %v1575_v11 = vld [vmem:[#allocation2 + $0xf8] sm:$0xff]  ;;  %v778_v51 = vpop.eup %777 }
  0x8f   :  { %v521_v53 = vmul.f32 %v774_v55, %v1839_v58  ;;  %314 = vst [vmem:[#allocation11 + $0xd0] sm:$0xff] %v282_v36  ;;  %315 = vst [vmem:[#allocation11 + $0xd8] sm:$0xff] %v283_v7  ;;  %v1577_v8 = vld [vmem:[#allocation5 + $0xf8] sm:$0xff]  ;;  %v1840_v57 = vld [vmem:[#allocation38_spill] sm:$0xff] }
  0x90   :  { %426 = vst [vmem:[#allocation14 + $0x50] sm:$0xff] %v394_v16  ;;  %v397_v1 = vmul.f32 %v1840_v57, %v1428_v13  ;;  %563 = vst [vmem:[#allocation15 + $0x98] sm:$0xff] %v519_v34  ;;  %v1841_v55 = vld [vmem:[#allocation25_spill] sm:$0xff]  ;;  %v287_v7 = vadd.f32 %v1577_v8, %v1575_v11  ;;  %v1842_v23 = vld [vmem:[#allocation39_spill] sm:$0xff]  ;;  %v780_v16 = vpop.eup %779 }
  0x91   :  { %v523_v36 = vmul.f32 %v776_v49, %v1841_v55  ;;  %316 = vst [vmem:[#allocation11 + $0xe0] sm:$0xff] %v284_v61  ;;  %427 = vst [vmem:[#allocation14 + $0x58] sm:$0xff] %v395_v48  ;;  %v398_v12 = vmul.f32 %v1842_v23, %v1432_v47  ;;  %v1843_v58 = vld [vmem:[#allocation40_spill] sm:$0xff]  ;;  %v1844_v13 = vld [vmem:[#allocation26_spill] sm:$0xff]  ;;  %v782_v55 = vpop.eup %781 }
  0x92   :  { %428 = vst [vmem:[#allocation14 + $0x60] sm:$0xff] %v396_v40  ;;  %v399_v3 = vmul.f32 %v1843_v58, %v1440_v4  ;;  %564 = vst [vmem:[#allocation15 + $0xa0] sm:$0xff] %v521_v53  ;;  %v525_v34 = vmul.f32 %v778_v51, %v1844_v13  ;;  %v1845_v61 = vld [vmem:[#allocation41_spill] sm:$0xff]  ;;  %v1846_v40 = vld [vmem:[#allocation42_spill] sm:$0xff] }
  0x93   :  { %317 = vst [vmem:[#allocation11 + $0xe8] sm:$0xff] %v285_v62  ;;  %318 = vst [vmem:[#allocation11 + $0xf0] sm:$0xff] %v286_v17  ;;  %v400_v49 = vmul.f32 %v1845_v61, %v1452_v19  ;;  %v401_v48 = vmul.f32 %v1846_v40, %v1456_v10  ;;  %v1847_v47 = vld [vmem:[#allocation43_spill] sm:$0xff]  ;;  %v1849_v17 = vld [vmem:[#allocation44_spill] sm:$0xff] }
  0x94   :  { %429 = vst [vmem:[#allocation14 + $0x68] sm:$0xff] %v397_v1  ;;  %v402_v57 = vmul.f32 %v1847_v47, %v1464_v59  ;;  %565 = vst [vmem:[#allocation15 + $0xa8] sm:$0xff] %v523_v36  ;;  %v1848_v4 = vld [vmem:[#allocation27_spill] sm:$0xff]  ;;  %v403_v53 = vmul.f32 %v1849_v17, %v1476_v24  ;;  %v1850_v19 = vld [vmem:[#allocation45_spill] sm:$0xff]  ;;  %v784_v59 = vpop.eup %783 }
  0x95   :  { %v527_v23 = vmul.f32 %v780_v16, %v1848_v4  ;;  %319 = vst [vmem:[#allocation11 + $0xf8] sm:$0xff] %v287_v7  ;;  %430 = vst [vmem:[#allocation14 + $0x70] sm:$0xff] %v398_v12  ;;  %v404_v62 = vmul.f32 %v1850_v19, %v1480_v15  ;;  %v1851_v10 = vld [vmem:[#allocation46_spill] sm:$0xff]  ;;  %v1852_v51 = vld [vmem:[#allocation28_spill] sm:$0xff] }
  0x96   :  { %431 = vst [vmem:[#allocation14 + $0x78] sm:$0xff] %v399_v3  ;;  %v405_v1 = vmul.f32 %v1851_v10, %v1488_v41  ;;  %566 = vst [vmem:[#allocation15 + $0xb0] sm:$0xff] %v525_v34  ;;  %v529_v36 = vmul.f32 %v782_v55, %v1852_v51  ;;  %v1853_v3 = vld [vmem:[#allocation47_spill] sm:$0xff]  ;;  %v1854_v7 = vld [vmem:[#allocation48_spill] sm:$0xff] }
  0x97   :  { %432 = vst [vmem:[#allocation14 + $0x80] sm:$0xff] %v400_v49  ;;  %433 = vst [vmem:[#allocation14 + $0x88] sm:$0xff] %v401_v48  ;;  %v406_v24 = vmul.f32 %v1853_v3, %v1500_v31  ;;  %v407_v12 = vmul.f32 %v1854_v7, %v1504_v22  ;;  %v1855_v15 = vld [vmem:[#allocation49_spill] sm:$0xff] }
  0x98   :  { %434 = vst [vmem:[#allocation14 + $0x90] sm:$0xff] %v402_v57  ;;  %v408_v58 = vmul.f32 %v1855_v15, %v1512_v27 }
  0x99   :  { %928 = shalt.err (!%p925_p6)
}
  0x9a   :  { %651 = dma.vmem_to_hbm [thread:$0]  %s1589_s17, 4096, %s1754_s5, [#allocation4], %s1011_s14, %s1011_s14, %s1012_s15   ;;  %v786_v41 = vpop.eup %785  ;;  %567 = vst [vmem:[#allocation15 + $0xb8] sm:$0xff] %v527_v23  ;;  %v1856_v31 = vld [vmem:[#allocation29_spill] sm:$0xff]  ;;  %435 = vst [vmem:[#allocation14 + $0x98] sm:$0xff] %v403_v53  ;;  %v1857_v27 = vld [vmem:[#allocation50_spill] sm:$0xff]  ;;  %v580_v3 = vmul.f32 %v1362_v0, %v1362_v0  ;;  %v583_v0 = vmul.f32 %v1384_v44, %v1384_v44 }
  0x9b   :  { %v531_v22 = vmul.f32 %v784_v59, %v1856_v31  ;;  %436 = vst [vmem:[#allocation14 + $0xa0] sm:$0xff] %v404_v62  ;;  %437 = vst [vmem:[#allocation14 + $0xa8] sm:$0xff] %v405_v1  ;;  %v409_v16 = vmul.f32 %v1857_v27, %v1524_v37  ;;  %v1858_v13 = vld [vmem:[#allocation51_spill] sm:$0xff]  ;;  %v1859_v61 = vld [vmem:[#allocation52_spill] sm:$0xff]  ;;  %v788_v40 = vpop.eup %787  ;;  %s1019_s5 = smov [#allocation15]   ;;  %v584_v31 = vmul.f32 %v1392_v25, %v1392_v25  ;;  %s937_s24 = scalar_lea.vmem %s1647_s19, 4096 }
  0x9c   :  { %v410_v34 = vmul.f32 %v1858_v13, %v1528_v14  ;;  %v411_v49 = vmul.f32 %v1859_v61, %v1536_v56  ;;  %568 = vst [vmem:[#allocation15 + $0xc0] sm:$0xff] %v529_v36  ;;  %v1860_v48 = vld [vmem:[#allocation30_spill] sm:$0xff]  ;;  %438 = vst [vmem:[#allocation14 + $0xb0] sm:$0xff] %v406_v24  ;;  %v1861_v57 = vld [vmem:[#allocation53_spill] sm:$0xff]  ;;  %v790_v17 = vpop.eup %789  ;;  %v578_v36 = vmul.f32 %v1353_v63, %v1353_v63  ;;  %s1656_s23 = sshll.u32 %s1019_s5, 4  ;;  %p938_p7 = scmp.ne.s32.totalorder %s1647_s19, %s937_s24  ;;  %s1691_s23 = int_to_ptr.vmem [resolvable:$true] %s1656_s23 }
  0x9d   :  { %v533_v47 = vmul.f32 %v786_v41, %v1860_v48  ;;  %439 = vst [vmem:[#allocation14 + $0xb8] sm:$0xff] %v407_v12  ;;  %440 = vst [vmem:[#allocation14 + $0xc0] sm:$0xff] %v408_v58  ;;  %v412_v55 = vmul.f32 %v1861_v57, %v1547_v42  ;;  %v1862_v4 = vld [vmem:[#allocation54_spill] sm:$0xff]  ;;  %v1863_v23 = vld [vmem:[#allocation55_spill] sm:$0xff]  ;;  %v581_v63 = vmul.f32 %v1369_v5, %v1369_v5  ;;  %p942_p8 = scmp.lt.s32.totalorder %s1647_s19, %s1647_s19  ;;  %p943_p9 = scmp.lt.s32.totalorder %s937_s24, %s937_s24 }
  0x9e   :  { %v413_v37 = vmul.f32 %v1862_v4, %v1551_v35  ;;  %v414_v14 = vmul.f32 %v1863_v23, %v1562_v45  ;;  %569 = vst [vmem:[#allocation15 + $0xc8] sm:$0xff] %v531_v22  ;;  %v1864_v56 = vld [vmem:[#allocation31_spill] sm:$0xff]  ;;  %441 = vst [vmem:[#allocation14 + $0xc8] sm:$0xff] %v409_v16  ;;  %v1865_v19 = vld [vmem:[#allocation56_spill] sm:$0xff]  ;;  %v792_v35 = vpop.eup %791  ;;  %v585_v22 = vmul.f32 %v1396_v2, %v1396_v2 }
  0x9f   :  { %v535_v53 = vmul.f32 %v788_v40, %v1864_v56  ;;  %442 = vst [vmem:[#allocation14 + $0xd0] sm:$0xff] %v410_v34  ;;  %443 = vst [vmem:[#allocation14 + $0xd8] sm:$0xff] %v411_v49  ;;  %v415_v62 = vmul.f32 %v1865_v19, %v1575_v11  ;;  %v1866_v10 = vld [vmem:[#allocation57_spill] sm:$0xff]  ;;  %v1867_v42 = vld [vmem:[#allocation58_spill] sm:$0xff]  ;;  %v579_v11 = vmul.f32 %v1355_v52, %v1355_v52  ;;  %v794_v24 = vpop.eup %793  ;;  %p944_p10 = por %p943_p9, %p942_p8 }
  0xa0   :  { %v576_v1 = vmul.f32 %v1866_v10, %v1866_v10  ;;  %v577_v59 = vmul.f32 %v1867_v42, %v1867_v42  ;;  %570 = vst [vmem:[#allocation15 + $0xd0] sm:$0xff] %v533_v47  ;;  %v1868_v45 = vld [vmem:[#allocation32_spill] sm:$0xff]  ;;  %444 = vst [vmem:[#allocation14 + $0xe0] sm:$0xff] %v412_v55  ;;  %v1869_v7 = vld [vmem:[#allocation33_spill] sm:$0xff]  ;;  %v582_v52 = vmul.f32 %v1373_v43, %v1373_v43  ;;  %v796_v15 = vpop.eup %795 }
  0xa1   :  { %v537_v51 = vmul.f32 %v790_v17, %v1868_v45  ;;  %445 = vst [vmem:[#allocation14 + $0xe8] sm:$0xff] %v413_v37  ;;  %446 = vst [vmem:[#allocation14 + $0xf0] sm:$0xff] %v414_v14  ;;  %v539_v12 = vmul.f32 %v792_v35, %v1869_v7  ;;  %v1870_v58 = vld [vmem:[#allocation34_spill] sm:$0xff]  ;;  %v586_v5 = vmul.f32 %v1407_v6, %v1407_v6  ;;  %p945_p11 = pnand %p944_p10, %p938_p7 }
  0xa2   :  { %571 = vst [vmem:[#allocation15 + $0xd8] sm:$0xff] %v535_v53  ;;  %447 = vst [vmem:[#allocation14 + $0xf8] sm:$0xff] %v415_v62  ;;  %v541_v41 = vmul.f32 %v794_v24, %v1870_v58 }
  0xa3   :  { %608 = vst [vmem:[#allocation17] sm:$0xff] %v576_v1  ;;  %609 = vst [vmem:[#allocation17 + $0x8] sm:$0xff] %v577_v59 }
  0xa4   :  { %572 = vst [vmem:[#allocation15 + $0xe0] sm:$0xff] %v537_v51  ;;  %610 = vst [vmem:[#allocation17 + $0x10] sm:$0xff] %v578_v36 }
  0xa5   :  { %611 = vst [vmem:[#allocation17 + $0x18] sm:$0xff] %v579_v11  ;;  %612 = vst [vmem:[#allocation17 + $0x20] sm:$0xff] %v580_v3 }
  0xa6   :  { %948 = shalt.err (!%p945_p11)
}
  0xa7   :  { %675 = dma.vmem_to_hbm [thread:$0]  %s1647_s19, 4096, %s1756_s7, [#allocation13], %s1011_s14, %s1011_s14, %s1012_s15   ;;  %573 = vst [vmem:[#allocation15 + $0xe8] sm:$0xff] %v539_v12  ;;  %v1871_v43 = vld [vmem:[#allocation35_spill] sm:$0xff]  ;;  %613 = vst [vmem:[#allocation17 + $0x28] sm:$0xff] %v581_v63  ;;  %v587_v25 = vmul.f32 %v1415_v20, %v1415_v20  ;;  %v588_v2 = vmul.f32 %v1419_v38, %v1419_v38  ;;  %v589_v6 = vmul.f32 %v1430_v60, %v1430_v60 }
  0xa8   :  { %v543_v44 = vmul.f32 %v796_v15, %v1871_v43  ;;  %614 = vst [vmem:[#allocation17 + $0x30] sm:$0xff] %v582_v52  ;;  %615 = vst [vmem:[#allocation17 + $0x38] sm:$0xff] %v583_v0  ;;  %v590_v27 = vmul.f32 %v1438_v26, %v1438_v26  ;;  %v591_v16 = vmul.f32 %v1442_v50, %v1442_v50  ;;  %s1020_s7 = smov [#allocation17]   ;;  %s957_s3 = scalar_lea.vmem %s1691_s23, 4096 }
  0xa9   :  { %574 = vst [vmem:[#allocation15 + $0xf0] sm:$0xff] %v541_v41  ;;  %616 = vst [vmem:[#allocation17 + $0x40] sm:$0xff] %v584_v31  ;;  %v592_v20 = vmul.f32 %v1454_v32, %v1454_v32  ;;  %v593_v38 = vmul.f32 %v1462_v9, %v1462_v9  ;;  %v594_v60 = vmul.f32 %v1466_v54, %v1466_v54  ;;  %s1709_s26 = sshll.u32 %s1020_s7, 4  ;;  %p958_p12 = scmp.ne.s32.totalorder %s1691_s23, %s957_s3  ;;  %s694_s26 = int_to_ptr.vmem [resolvable:$true] %s1709_s26 }
  0xaa   :  { %617 = vst [vmem:[#allocation17 + $0x48] sm:$0xff] %v585_v22  ;;  %618 = vst [vmem:[#allocation17 + $0x50] sm:$0xff] %v586_v5  ;;  %v595_v26 = vmul.f32 %v1478_v18, %v1478_v18  ;;  %v596_v50 = vmul.f32 %v1486_v39, %v1486_v39  ;;  %v597_v32 = vmul.f32 %v1490_v28, %v1490_v28  ;;  %p962_p13 = scmp.lt.s32.totalorder %s1691_s23, %s1691_s23  ;;  %p963_p0 = scmp.lt.s32.totalorder %s957_s3, %s957_s3 }
  0xab   :  { %575 = vst [vmem:[#allocation15 + $0xf8] sm:$0xff] %v543_v44  ;;  %619 = vst [vmem:[#allocation17 + $0x58] sm:$0xff] %v587_v25  ;;  %v598_v9 = vmul.f32 %v1502_v30, %v1502_v30  ;;  %v599_v54 = vmul.f32 %v1510_v29, %v1510_v29  ;;  %v600_v18 = vmul.f32 %v1514_v33, %v1514_v33 }
  0xac   :  { %620 = vst [vmem:[#allocation17 + $0x60] sm:$0xff] %v588_v2  ;;  %621 = vst [vmem:[#allocation17 + $0x68] sm:$0xff] %v589_v6  ;;  %v601_v39 = vmul.f32 %v1526_v21, %v1526_v21  ;;  %p964_p1 = por %p963_p0, %p962_p13 }
  0xad   :  { %622 = vst [vmem:[#allocation17 + $0x70] sm:$0xff] %v590_v27  ;;  %623 = vst [vmem:[#allocation17 + $0x78] sm:$0xff] %v591_v16 }
  0xae   :  { %624 = vst [vmem:[#allocation17 + $0x80] sm:$0xff] %v592_v20  ;;  %625 = vst [vmem:[#allocation17 + $0x88] sm:$0xff] %v593_v38  ;;  %p965_p2 = pnand %p964_p1, %p958_p12 }
  0xb0   :  { %968 = shalt.err (!%p965_p2)
}
  0xb1   :  { %687 = dma.vmem_to_hbm [thread:$0]  %s1691_s23, 4096, %s1757_s8, [#allocation16], %s1011_s14, %s1011_s14, %s1012_s15   ;;  %626 = vst [vmem:[#allocation17 + $0x90] sm:$0xff] %v594_v60  ;;  %627 = vst [vmem:[#allocation17 + $0x98] sm:$0xff] %v595_v26  ;;  %v1872_v28 = vld [vmem:[#allocation59_spill] sm:$0xff]  ;;  %v1873_v29 = vld [vmem:[#allocation60_spill] sm:$0xff]  ;;  %v605_v34 = vmul.f32 %v1560_v46, %v1560_v46  ;;  %v607_v40 = vmul.f32 %v1577_v8, %v1577_v8 }
  0xb2   :  { %628 = vst [vmem:[#allocation17 + $0xa0] sm:$0xff] %v596_v50  ;;  %629 = vst [vmem:[#allocation17 + $0xa8] sm:$0xff] %v597_v32  ;;  %v602_v30 = vmul.f32 %v1872_v28, %v1872_v28  ;;  %v603_v33 = vmul.f32 %v1873_v29, %v1873_v29  ;;  %v1874_v21 = vld [vmem:[#allocation61_spill] sm:$0xff]  ;;  %v1875_v61 = vld [vmem:[#allocation62_spill] sm:$0xff]  ;;  %s977_s8 = scalar_lea.vmem %s694_s26, 4096  ;;  %p982_p4 = scmp.lt.s32.totalorder %s694_s26, %s694_s26 }
  0xb3   :  { %v604_v13 = vmul.f32 %v1874_v21, %v1874_v21  ;;  %630 = vst [vmem:[#allocation17 + $0xb0] sm:$0xff] %v598_v9  ;;  %631 = vst [vmem:[#allocation17 + $0xb8] sm:$0xff] %v599_v54  ;;  %v606_v49 = vmul.f32 %v1875_v61, %v1875_v61  ;;  %p978_p3 = scmp.ne.s32.totalorder %s694_s26, %s977_s8  ;;  %p983_p5 = scmp.lt.s32.totalorder %s977_s8, %s977_s8 }
  0xb4   :  { %632 = vst [vmem:[#allocation17 + $0xc0] sm:$0xff] %v600_v18  ;;  %633 = vst [vmem:[#allocation17 + $0xc8] sm:$0xff] %v601_v39 }
  0xb5   :  { %634 = vst [vmem:[#allocation17 + $0xd0] sm:$0xff] %v602_v30  ;;  %635 = vst [vmem:[#allocation17 + $0xd8] sm:$0xff] %v603_v33  ;;  %p984_p6 = por %p983_p5, %p982_p4 }
  0xb6   :  { %636 = vst [vmem:[#allocation17 + $0xe0] sm:$0xff] %v604_v13  ;;  %637 = vst [vmem:[#allocation17 + $0xe8] sm:$0xff] %v605_v34 }
  0xb7   :  { %638 = vst [vmem:[#allocation17 + $0xf0] sm:$0xff] %v606_v49  ;;  %639 = vst [vmem:[#allocation17 + $0xf8] sm:$0xff] %v607_v40  ;;  %p985_p7 = pnand %p984_p6, %p978_p3 }
  0xb9   :  { %988 = shalt.err (!%p985_p7)
}
  0xba   :  { %699 = dma.vmem_to_hbm [thread:$0]  %s694_s26, 4096, %s1758_s9, [#allocation16], %s1011_s14, %s1011_s14, %s1012_s15  }
  0xbb   :  { %1003 = dma.done.wait [#allocation4], 4096  }
  0xbc   :  { %1004 = vsyncadd [#allocation4], 4294963200 }
  0xbd   :  { %1005 = dma.done.wait [#allocation13], 8192  }
  0xbe   :  { %1006 = vsyncadd [#allocation13], 4294959104 }
  0xbf   :  { %1007 = dma.done.wait [#allocation16], 8192  }
  0xc0   :  { %1008 = vsyncadd [#allocation16], 4294959104 }
  0xc1   :  { %715 = vsyncpa [#allocation3], 1 }
  0xc2   :  { %716 = vsyncpa [#allocation6], 1 }
  0xc3   :  { %717 = vsyncpa [#allocation9], 1 }
  0xc4   :  { %718 = vsyncpa [#allocation4], 1 }
  0xc5   :  { %719 = vsyncpa [#allocation13], 1 }
  0xc6   :  { %720 = vsyncpa [#allocation16], 1 }

</bundles_post_ra>
